<compile_context>
chip_gen: v5e
topology: v5e:2x2
jax: 0.10.0
libtpu: 0.0.40
codegen_flags: <defaults>
</compile_context>

<pallas_src>
import jax
import jax.numpy as jnp
from jax import lax
from jax.experimental import pallas as pl
from jax.experimental.pallas import tpu as pltpu

_LANE = 128


def _round_up(x, m):
    return ((x + m - 1) // m) * m


def _critic_kernel(xT_ref, w1_ref, b1w2_ref, b2_ref, o_ref):
    # xT  : (S, TILE_B)  streamed input tile, batch on the lane axis
    # w1  : (S, Hp)      first-layer weights, natural orientation (resident, lane-dense)
    # b1w2: (Hp, 2)      f32 resident block; column 0 = b1, column 1 = w2
    # b2  : (1, 1) SMEM  second-layer bias (scalar path)
    # o   : (1, TILE_B)  critic values, lane-dense unmasked store
    hT = lax.dot_general(
        w1_ref[...], xT_ref[...],
        dimension_numbers=(((0,), (0,)), ((), ())),   # contract over S (sublanes)
        preferred_element_type=jnp.float32,
    )                                                  # (Hp, TILE_B), f32 accumulation
    b1 = b1w2_ref[:, 0:1]                              # (Hp, 1)
    w2 = b1w2_ref[:, 1:2]                              # (Hp, 1)
    hT = jnp.maximum(hT + b1, 0.0)                     # bias + ReLU on the VPU (f32)
    # Second layer (out_features == 1): VPU multiply + XLU sublane reduction.
    y = jnp.sum(hT * w2, axis=0, keepdims=True) + b2_ref[0, 0]
    o_ref[...] = y.astype(o_ref.dtype)                 # (1, TILE_B) unmasked store


def _choose_tiling(B, S, Hp, x_itemsize, tile_b=None):
    Bp128 = _round_up(max(B, 1), _LANE)
    if tile_b is None:
        # Large batch tiles amortize the ~0.35us per-grid-step overhead; keep
        # grid_b at 1-4 steps.
        tile_b = min(Bp128, 4096)
        # v7x megacore: once there are >= 2 lane-tiles of batch, keep grid_b
        # even so ("parallel",) can shard tiles across both TensorCores.
        if B >= 2 * _LANE:
            tile_b = min(tile_b, _round_up(-(-Bp128 // 2), _LANE))
        # VMEM guard (v7x: 64 MiB physical / 32 MiB default scoped): the
        # (Hp, tile_b) f32 hidden intermediate plus double-buffered input
        # tiles must stay well under the scoped limit.
        budget = 16 << 20
        while tile_b > _LANE and (Hp * tile_b * 4 + 2 * S * tile_b * x_itemsize) > budget:
            tile_b = max(_LANE, _round_up(tile_b // 2, _LANE))
    tile_b = _round_up(tile_b, _LANE)
    Bp = _round_up(max(B, tile_b), tile_b)
    return tile_b, Bp, Bp // tile_b


def prepare_critic_params(w1, b1, w2, b2, *, matmul_dtype=jnp.bfloat16):
    """One-time weight-side layout plumbing (hoist this out of the per-call path).

    Note: an int8 w1 variant is only viable on v5e/v6e (v7x MXU has no integer
    mode); keep bf16/f32 (or fp8) for a v7x deployment.
    """
    w1 = jnp.asarray(w1, jnp.float32)
    S, H = w1.shape
    Hp = _round_up(max(H, _LANE), _LANE)
    pad_h = Hp - H
    w1p = jnp.pad(w1, ((0, 0), (0, pad_h)))                                  # (S, Hp)
    if matmul_dtype is not None:
        w1p = w1p.astype(matmul_dtype)
    b1c = jnp.pad(jnp.asarray(b1, jnp.float32).reshape(-1, 1), ((0, pad_h), (0, 0)))
    w2c = jnp.pad(jnp.asarray(w2, jnp.float32).reshape(-1, 1), ((0, pad_h), (0, 0)))
    b1w2 = jnp.concatenate([b1c, w2c], axis=1)                               # (Hp, 2)
    b2s = jnp.asarray(b2, jnp.float32).reshape(1, 1)                         # (1, 1)
    return {
        "w1": w1p, "b1w2": b1w2, "b2": b2s,
        "state_dim": S, "hidden": H, "hidden_padded": Hp,
        "matmul_dtype": matmul_dtype,
    }


def critic_forward_prepared(state, params, *, tile_b=None):
    """relu(state @ W1 + b1) @ w2 + b2 using pre-laid-out params. Returns (B, 1) f32."""
    B, S = state.shape
    assert S == params["state_dim"], (S, params["state_dim"])
    Hp = params["hidden_padded"]
    mmdt = params["matmul_dtype"]
    x_itemsize = jnp.dtype(mmdt).itemsize if mmdt is not None else 4

    tile_b, Bp, grid_b = _choose_tiling(B, S, Hp, x_itemsize, tile_b)

    # Activation layout plumbing: one transpose so the batch lives on the lane
    # axis. Zero padding is exact (relu(0)=0, padded w2 rows are 0, padded
    # batch columns are sliced off).
    xT = jnp.asarray(state, jnp.float32).T
    if mmdt is not None:
        xT = xT.astype(mmdt)
    xT = jnp.pad(xT, ((0, 0), (0, Bp - B)))                                  # (S, Bp)

    grid_spec = pltpu.PrefetchScalarGridSpec(
        num_scalar_prefetch=0,
        grid=(grid_b,),
        in_specs=[
            pl.BlockSpec((S, tile_b), lambda i: (0, i)),          # streamed x tile
            pl.BlockSpec((S, Hp), lambda i: (0, 0)),              # W1 resident (lane-dense)
            pl.BlockSpec((Hp, 2), lambda i: (0, 0)),              # [b1 | w2] resident
            pl.BlockSpec(memory_space=pltpu.MemorySpace.SMEM),    # b2 scalar
        ],
        out_specs=pl.BlockSpec((1, tile_b), lambda i: (0, i)),
    )

    out_row = pl.pallas_call(
        _critic_kernel,
        out_shape=jax.ShapeDtypeStruct((1, Bp), jnp.float32),
        grid_spec=grid_spec,
        compiler_params=pltpu.CompilerParams(
            dimension_semantics=("parallel",),   # batch tiles across both TCs (v7x)
        ),
    )(xT, params["w1"], params["b1w2"], params["b2"])

    return out_row[0, :B].reshape(B, 1)


def critic_forward(state, w1, b1, w2, b2, *, matmul_dtype=jnp.bfloat16,
                   tile_b=None, force_pallas=False):
    """CriticNetwork forward: relu(state @ w1 + b1) @ w2 + b2 -> (B, 1) float32."""
    B, S = state.shape
    H = w1.shape[1]
    # Small-problem fallback: at toy sizes the op is a few KFLOPs and kernel
    # launch + wrapper ops are 100% overhead -> plain XLA fusion wins.
    if not force_pallas and 2 * B * S * H < 1_000_000:
        h = jnp.maximum(
            jnp.asarray(state, jnp.float32) @ jnp.asarray(w1, jnp.float32)
            + jnp.asarray(b1, jnp.float32), 0.0)
        return h @ jnp.asarray(w2, jnp.float32) + jnp.asarray(b2, jnp.float32)

    params = prepare_critic_params(w1, b1, w2, b2, matmul_dtype=matmul_dtype)
    return critic_forward_prepared(state, params, tile_b=tile_b)


def init_critic_params(key, state_dim, hidden_dim):
    """Deterministic init matching nn.Linear's default U(-1/sqrt(fan_in), 1/sqrt(fan_in))."""
    k1, k2, k3, k4 = jax.random.split(key, 4)
    lim1 = 1.0 / jnp.sqrt(jnp.float32(state_dim))
    lim2 = 1.0 / jnp.sqrt(jnp.float32(hidden_dim))
    w1 = jax.random.uniform(k1, (state_dim, hidden_dim), jnp.float32, -lim1, lim1)
    b1 = jax.random.uniform(k2, (hidden_dim,), jnp.float32, -lim1, lim1)
    w2 = jax.random.uniform(k3, (hidden_dim, 1), jnp.float32, -lim2, lim2)
    b2 = jax.random.uniform(k4, (1,), jnp.float32, -lim2, lim2)
    return w1, b1, w2, b2


if __name__ == "__main__":
    batch, state_dim, hidden_dim = 8, 16, 32

    key = jax.random.PRNGKey(0)
    k_state, k_params, k_state2 = jax.random.split(key, 3)
    state = jax.random.normal(k_state, (batch, state_dim), jnp.float32)
    w1, b1, w2, b2 = init_critic_params(k_params, state_dim, hidden_dim)
    ref = jnp.maximum(state @ w1 + b1, 0.0) @ w2 + b2

    # 1) Pallas kernel, exact f32 operand path.
    out_f32 = jax.block_until_ready(
        critic_forward(state, w1, b1, w2, b2, matmul_dtype=None, force_pallas=True))
    assert out_f32.shape == (batch, 1)
    assert jnp.allclose(out_f32, ref, atol=1e-5, rtol=1e-5), (out_f32, ref)

    # 2) Pallas kernel, default bf16 first-matmul operands (f32 accumulation);
    #    tolerance relaxed accordingly.
    out_bf16 = jax.block_until_ready(
        critic_forward(state, w1, b1, w2, b2, force_pallas=True))
    assert jnp.allclose(out_bf16, ref, atol=5e-2, rtol=5e-2), (out_bf16, ref)

    # 3) Multi-tile grid path (B=300 -> tile_b=256, grid_b=2, batch padding).
    batch2 = 300
    state2 = jax.random.normal(k_state2, (batch2, state_dim), jnp.float32)
    ref2 = jnp.maximum(state2 @ w1 + b1, 0.0) @ w2 + b2
    out2 = jax.block_until_ready(
        critic_forward(state2, w1, b1, w2, b2, force_pallas=True))
    assert out2.shape == (batch2, 1)
    assert jnp.allclose(out2, ref2, atol=5e-2, rtol=5e-2), (out2, ref2)

    # 4) Small-problem fallback (default path at these toy shapes).
    out_fb = jax.block_until_ready(critic_forward(state, w1, b1, w2, b2))
    assert jnp.allclose(out_fb, ref, atol=1e-5, rtol=1e-5), (out_fb, ref)

    print("KERNEL_OK")
</pallas_src>

<mosaic_0001>
module attributes {stable_mosaic.version = 11 : i64} {
  func.func @_critic_kernel(%arg0: i32, %arg1: memref<16x128xf32, #tpu.memory_space<vmem>>, %arg2: memref<16x128xf32, #tpu.memory_space<vmem>>, %arg3: memref<128x2xf32, #tpu.memory_space<vmem>>, %arg4: memref<1x1xf32, #tpu.memory_space<smem>>, %arg5: memref<1x128xf32, #tpu.memory_space<vmem>>) attributes {dimension_semantics = [#tpu.dimension_semantics<parallel>], iteration_bounds = array<i64: 1>, scalar_prefetch = 0 : i64, scratch_operands = 0 : i64, tpu.core_type = #tpu.core_type<tc>, window_params = [{transform_indices = @transform_0, window_bounds = array<i64: 16, 128>}, {pipeline_mode = #tpu.pipeline_mode<synchronous>, transform_indices = @transform_1, window_bounds = array<i64: 16, 128>}, {pipeline_mode = #tpu.pipeline_mode<synchronous>, transform_indices = @transform_2, window_bounds = array<i64: 128, 2>}, {transform_indices = @transform_3, window_bounds = array<i64: 1, 1>}, {transform_indices = @transform_4, window_bounds = array<i64: 1, 128>}]} {
    %c0 = arith.constant 0 : index
    %c0_0 = arith.constant 0 : index
    %0 = vector.load %arg2[%c0, %c0_0] : memref<16x128xf32, #tpu.memory_space<vmem>>, vector<16x128xf32>
    %c0_1 = arith.constant 0 : index
    %c0_2 = arith.constant 0 : index
    %1 = vector.load %arg1[%c0_1, %c0_2] : memref<16x128xf32, #tpu.memory_space<vmem>>, vector<16x128xf32>
    %cst = arith.constant dense<0.000000e+00> : vector<128x128xf32>
    %2 = tpu.matmul %0, %1, %cst {dimension_numbers = #tpu.dot_dimension_numbers<[0], [0], [1], [1], [0, 1, 1, 1], [], []>} : vector<16x128xf32>, vector<16x128xf32>, vector<128x128xf32> -> vector<128x128xf32>
    %c0_3 = arith.constant 0 : index
    %c0_4 = arith.constant 0 : index
    %3 = vector.load %arg3[%c0_3, %c0_4] : memref<128x2xf32, #tpu.memory_space<vmem>>, vector<128x1xf32>
    %c0_5 = arith.constant 0 : index
    %c1 = arith.constant 1 : index
    %4 = vector.load %arg3[%c0_5, %c1] : memref<128x2xf32, #tpu.memory_space<vmem>>, vector<128x1xf32>
    %5 = vector.broadcast %3 : vector<128x1xf32> to vector<128x128xf32>
    %6 = arith.addf %2, %5 : vector<128x128xf32>
    %cst_6 = arith.constant 0.000000e+00 : f32
    %7 = vector.broadcast %cst_6 : f32 to vector<128x128xf32>
    %8 = arith.maximumf %6, %7 : vector<128x128xf32>
    %9 = vector.broadcast %4 : vector<128x1xf32> to vector<128x128xf32>
    %10 = arith.mulf %8, %9 : vector<128x128xf32>
    %cst_7 = arith.constant dense<0.000000e+00> : vector<128xf32>
    %11 = vector.multi_reduction <add>, %10, %cst_7 [0] : vector<128x128xf32> to vector<128xf32>
    %12 = vector.shape_cast %11 : vector<128xf32> to vector<1x128xf32>
    %c0_8 = arith.constant 0 : index
    %c0_9 = arith.constant 0 : index
    %13 = memref.load %arg4[%c0_8, %c0_9] : memref<1x1xf32, #tpu.memory_space<smem>>
    %14 = vector.broadcast %13 : f32 to vector<1x128xf32>
    %15 = arith.addf %12, %14 : vector<1x128xf32>
    %c0_10 = arith.constant 0 : index
    %c0_11 = arith.constant 0 : index
    %16 = vector.load %arg5[%c0_10, %c0_11] : memref<1x128xf32, #tpu.memory_space<vmem>>, vector<1x128xf32>
    tpu.vector_store %arg5[%c0_10, %c0_11], %15 {strides = array<i32>} : memref<1x128xf32, #tpu.memory_space<vmem>>, vector<1x128xf32>,
    return
  }
  func.func @transform_0(%arg0: i32) -> (i32, i32) {
    %c0_i32 = arith.constant 0 : i32
    %c0_i32_0 = arith.constant 0 : i32
    return %c0_i32, %arg0 : i32, i32
  }
  func.func @transform_1(%arg0: i32) -> (i32, i32) {
    %c0_i32 = arith.constant 0 : i32
    %c0_i32_0 = arith.constant 0 : i32
    %c0_i32_1 = arith.constant 0 : i32
    return %c0_i32, %c0_i32_0 : i32, i32
  }
  func.func @transform_2(%arg0: i32) -> (i32, i32) {
    %c0_i32 = arith.constant 0 : i32
    %c0_i32_0 = arith.constant 0 : i32
    %c0_i32_1 = arith.constant 0 : i32
    return %c0_i32, %c0_i32_0 : i32, i32
  }
  func.func @transform_3(%arg0: i32) -> (i32, i32) {
    %c0_i32 = arith.constant 0 : i32
    %c0_i32_0 = arith.constant 0 : i32
    %c0_i32_1 = arith.constant 0 : i32
    return %c0_i32, %c0_i32_0 : i32, i32
  }
  func.func @transform_4(%arg0: i32) -> (i32, i32) {
    %c0_i32 = arith.constant 0 : i32
    %c0_i32_0 = arith.constant 0 : i32
    return %c0_i32, %arg0 : i32, i32
  }
}

</mosaic_0001>

<bundles_post_ra>
// kernel: tpu_custom_call.1
= control target key start
LH: loop header
LB: loop body
LE: loop exit
PB: predicated region body
PF: predicated region fallthrough
CT: control target
= control target key end

     0   :  { %v460_v2 = vmov 0   ;;  %s595_s0 = inlined_call_operand.vmem [shape: f32[16,128], index: 0, kind: input, shape index: {}]   ;;  %s596_s1 = inlined_call_operand.vmem [shape: f32[16,128], index: 1, kind: input, shape index: {}]   ;;  %s597_s2 = inlined_call_operand.vmem [shape: f32[128,2], index: 2, kind: input, shape index: {}]   ;;  %s598_s3 = inlined_call_operand.<no memory space> [shape: f32[1,1], index: 3, kind: input, shape index: {}]   ;;  %s599_s4 = inlined_call_operand.hbm [shape: f32[1,128], index: 4, kind: output, shape index: {}]  }
   0x1   :  { %v19_v0 = vld [vmem:[%s596_s1] sm:$0xff]  ;;  %428 = vset.pattern.permute.xlu0 %v460_v2  ;;  %v497_v3 = vld [vmem:[%s597_s2 + $0x10] sm:$0xff]  ;;  %429 = vset.pattern.permute.xlu1 %v460_v2  ;;  %v22_v4 = vld [vmem:[%s595_s0 + $0x8] sm:$0xff] }
   0x2   :  { %v23_v1 = vld [vmem:[%s597_s2] sm:$0xff]  ;;  %119 = vxpose.xlu2.b32.start [1/2] (short) %v19_v0, 128  ;;  %51 = vperm.xlu1 %429, %v497_v3  }
   0x3   :  { %41 = vperm.xlu0 %428, %v23_v1   ;;  %214 = vmatpush.msra.mxu0 %v22_v4 }
   0x4   :  { %418 = vmatpush.msra.mxu1 %v22_v4 }
   0x5   :  { %10 = vsyncpa [#allocation4], 0  ;;  %419 = vmatpush.msra.mxu2 %v22_v4  ;;  %420 = vmatpush.msra.mxu3 %v22_v4  ;;  %v20_v5 = vld [vmem:[%s596_s1 + $0x8] sm:$0xff]  ;;  %v26_v7 = vld [vmem:[%s597_s2 + $0x18] sm:$0xff]  ;;  %v461_v19 = vmov 1   ;;  %vm151_vm0 = vcmask 130048  }
   0x6   :  { %v24_v6 = vld [vmem:[%s597_s2 + $0x8] sm:$0xff]  ;;  %v21_v8 = vld [vmem:[%s595_s0] sm:$0xff]  ;;  %v29_v9 = vld [vmem:[%s597_s2 + $0x30] sm:$0xff]  ;;  %s462_s28 = smov [#allocation3]   ;;  %s393_s5 = sshll.u32 %s599_s4, 4  ;;  %s394_s5 = int_to_ptr.hbm [resolvable:$true] %s393_s5 }
   0x7   :  { %215 = vmatpush.msra.mxu0 %v21_v8  ;;  %421 = vmatpush.msra.mxu1 %v21_v8  ;;  %v30_v10 = vld [vmem:[%s597_s2 + $0x38] sm:$0xff]  ;;  %v31_v11 = vld [vmem:[%s597_s2 + $0x40] sm:$0xff]  ;;  %v32_v12 = vld [vmem:[%s597_s2 + $0x48] sm:$0xff]  ;;  %s391_s29 = sshll.u32 %s462_s28, 4  ;;  %s392_s29 = int_to_ptr.vmem [resolvable:$true] %s391_s29 }
   0x8   :  { %422 = vmatpush.msra.mxu2 %v21_v8  ;;  %423 = vmatpush.msra.mxu3 %v21_v8  ;;  %v33_v13 = vld [vmem:[%s597_s2 + $0x50] sm:$0xff]  ;;  %v34_v14 = vld [vmem:[%s597_s2 + $0x58] sm:$0xff]  ;;  %v35_v15 = vld [vmem:[%s597_s2 + $0x60] sm:$0xff] }
   0x9   :  { %v36_v16 = vld [vmem:[%s597_s2 + $0x68] sm:$0xff]  ;;  %v37_v17 = vld [vmem:[%s597_s2 + $0x70] sm:$0xff]  ;;  %v38_v18 = vld [vmem:[%s597_s2 + $0x78] sm:$0xff] }
   0xa   :  { %120 = vxpose.xlu2.b32.end [2/2] (short) %v20_v5, 128  ;;  %56 = vperm.xlu1 %429, %v26_v7   ;;  %v28_v22 = vld [vmem:[%s597_s2 + $0x28] sm:$0xff]  ;;  %v27_v24 = vld [vmem:[%s597_s2 + $0x20] sm:$0xff] }
   0xb   :  { %46 = vperm.xlu0 %428, %v24_v6  }
  0x12   :  { %76 = vperm.xlu1 %429, %v30_v10  }
  0x13   :  { %71 = vperm.xlu0 %428, %v29_v9  }
  0x1a   :  { %86 = vperm.xlu1 %429, %v32_v12  }
  0x1b   :  { %81 = vperm.xlu0 %428, %v31_v11  }
  0x22   :  { %96 = vperm.xlu1 %429, %v34_v14  }
  0x23   :  { %91 = vperm.xlu0 %428, %v33_v13  }
  0x2a   :  { %106 = vperm.xlu1 %429, %v36_v16  }
  0x2b   :  { %101 = vperm.xlu0 %428, %v35_v15  }
  0x32   :  { %116 = vperm.xlu1 %429, %v38_v18  }
  0x33   :  { %111 = vperm.xlu0 %428, %v37_v17  }
  0x3a   :  { %432 = vset.pattern.permute.xlu1 %v461_v19 }
  0x3b   :  { %431 = vset.pattern.permute.xlu0 %v461_v19  ;;  %286 = vperm.xlu1 %432, %v24_v6  }
  0x3c   :  { %282 = vperm.xlu0 %431, %v23_v1  }
  0x43   :  { %294 = vperm.xlu1 %432, %v26_v7  }
  0x44   :  { %298 = vperm.xlu0 %431, %v27_v24  }
  0x4b   :  { %302 = vperm.xlu1 %432, %v28_v22  }
  0x4c   :  { %306 = vperm.xlu0 %431, %v29_v9  }
  0x53   :  { %310 = vperm.xlu1 %432, %v30_v10  }
  0x54   :  { %314 = vperm.xlu0 %431, %v31_v11  }
  0x5b   :  { %318 = vperm.xlu1 %432, %v32_v12  }
  0x5c   :  { %322 = vperm.xlu0 %431, %v33_v13  }
  0x63   :  { %326 = vperm.xlu1 %432, %v34_v14  }
  0x64   :  { %330 = vperm.xlu0 %431, %v35_v15  }
  0x6b   :  { %334 = vperm.xlu1 %432, %v36_v16  }
  0x6c   :  { %430 = vset.pattern.permute.xlu2 %v460_v2  ;;  %338 = vperm.xlu0 %431, %v37_v17  }
  0x73   :  { %342 = vperm.xlu1 %432, %v38_v18  }
  0x74   :  { %v52_v35 = vpop.permute.xlu1 %51 }
  0x75   :  { %v42_v36 = vpop.permute.xlu0 %41 }
  0x7c   :  { %v57_v38 = vpop.permute.xlu1 %56 }
  0x7d   :  { %v47_v39 = vpop.permute.xlu0 %46 }
  0x84   :  { %v77_v41 = vpop.permute.xlu1 %76 }
  0x85   :  { %v72_v42 = vpop.permute.xlu0 %71 }
  0x8c   :  { %v568_v44 = vpop.permute.xlu1 %86 }
  0x8d   :  { %v82_v45 = vpop.permute.xlu0 %81 }
  0x94   :  { %v570_v46 = vpop.permute.xlu1 %96 }
  0x95   :  { %v572_v47 = vpop.permute.xlu0 %91 }
  0x9b   :  { %v135_v20 = vpop.trf.xlu2 }
  0x9c   :  { %402 = vmatmul.msk.f32.vlgmr.msra.gmra.mxu0 %vm151_vm0, %v135_v20  ;;  %v574_v49 = vpop.permute.xlu1 %106 }
  0x9d   :  { %v576_v50 = vpop.permute.xlu0 %101 }
  0xa3   :  { %v136_v21 = vpop.trf.xlu2 }
  0xa4   :  { %403 = vmatmul.msk.f32.gmra.mxu0 %vm151_vm0, %v136_v21  ;;  %v578_v52 = vpop.permute.xlu1 %116 }
  0xa5   :  { %v580_v54 = vpop.permute.xlu0 %111 }
  0xab   :  { %v137_v23 = vpop.trf.xlu2 }
  0xac   :  { %404 = vmatmul.msk.f32.gmra.mxu0 %vm151_vm0, %v137_v23 }
  0xad   :  { %v287_v57 = vpop.permute.xlu1 %286 }
  0xae   :  { %v283_v60 = vpop.permute.xlu0 %282 }
  0xb3   :  { %v138_v25 = vpop.trf.xlu2 }
  0xb4   :  { %405 = vmatmul.msk.f32.gmra.mxu0 %vm151_vm0, %v138_v25 }
  0xb5   :  { %v295_v4 = vpop.permute.xlu1 %294 }
  0xb6   :  { %v299_v7 = vpop.permute.xlu0 %298 }
  0xbb   :  { %v139_v26 = vpop.trf.xlu2 }
  0xbc   :  { %406 = vmatmul.msk.f32.vlgmr.msra.gmra.mxu1 %vm151_vm0, %v139_v26 }
  0xc3   :  { %v140_v27 = vpop.trf.xlu2 }
  0xc4   :  { %407 = vmatmul.msk.f32.gmra.mxu1 %vm151_vm0, %v140_v27  ;;  %v307_v27 = vpop.permute.xlu0 %306 }
  0xcb   :  { %v141_v28 = vpop.trf.xlu2 }
  0xcc   :  { %408 = vmatmul.msk.f32.gmra.mxu1 %vm151_vm0, %v141_v28 }
  0xd3   :  { %v142_v29 = vpop.trf.xlu2 }
  0xd4   :  { %409 = vmatmul.msk.f32.gmra.mxu1 %vm151_vm0, %v142_v29 }
  0xdb   :  { %v143_v30 = vpop.trf.xlu2 }
  0xdc   :  { %410 = vmatmul.msk.f32.vlgmr.msra.gmra.mxu2 %vm151_vm0, %v143_v30 }
  0xe3   :  { %61 = vperm.xlu2 %430, %v27_v24   ;;  %v144_v31 = vpop.trf.xlu2  ;;  %v303_v24 = vpop.permute.xlu1 %302 }
  0xe4   :  { %411 = vmatmul.msk.f32.gmra.mxu2 %vm151_vm0, %v144_v31 }
  0xeb   :  { %66 = vperm.xlu2 %430, %v28_v22   ;;  %v145_v32 = vpop.trf.xlu2 }
  0xec   :  { %412 = vmatmul.msk.f32.gmra.mxu2 %vm151_vm0, %v145_v32 }
  0xf3   :  { %433 = vset.pattern.permute.xlu2 %v461_v19  ;;  %v146_v33 = vpop.trf.xlu2 }
  0xf4   :  { %290 = vperm.xlu2 %433, %v497_v3   ;;  %413 = vmatmul.msk.f32.gmra.mxu2 %vm151_vm0, %v146_v33 }
  0xfb   :  { %v147_v34 = vpop.trf.xlu2 }
  0xfc   :  { %414 = vmatmul.msk.f32.vlgmr.msra.gmra.mxu3 %vm151_vm0, %v147_v34 }
 0x103   :  { %v148_v37 = vpop.trf.xlu2 }
 0x104   :  { %415 = vmatmul.msk.f32.gmra.mxu3 %vm151_vm0, %v148_v37 }
 0x10b   :  { %v149_v40 = vpop.trf.xlu2 }
 0x10c   :  { %416 = vmatmul.msk.f32.gmra.mxu3 %vm151_vm0, %v149_v40 }
 0x113   :  { %v150_v43 = vpop.trf.xlu2 }
 0x114   :  { %417 = vmatmul.msk.f32.gmra.mxu3 %vm151_vm0, %v150_v43 }
 0x119   :  { %v217_v48 = vpop.f32.mrf.mxu0 }
 0x11a   :  { %v218_v61 = vadd.f32 %v217_v48, %v42_v36  ;;  %v311_v36 = vpop.permute.xlu1 %310 }
 0x11c   :  { %v265_v1 = vmax.f32 %v218_v61, 0.0 }
 0x11e   :  { %v345_v9 = vmul.f32 %v283_v60, %v265_v1 }
 0x121   :  { %v220_v51 = vpop.f32.mrf.mxu0 }
 0x122   :  { %v221_v59 = vadd.f32 %v220_v51, %v47_v39  ;;  %v315_v39 = vpop.permute.xlu0 %314 }
 0x124   :  { %v266_v0 = vmax.f32 %v221_v59, 0.0 }
 0x126   :  { %v346_v5 = vmul.f32 %v287_v57, %v266_v0 }
 0x128   :  { %v361_v14 = vadd.f32 %v346_v5, %v345_v9 }
 0x129   :  { %v223_v55 = vpop.f32.mrf.mxu0 }
 0x12a   :  { %v224_v2 = vadd.f32 %v223_v55, %v52_v35  ;;  %v323_v59 = vpop.permute.xlu0 %322 }
 0x12c   :  { %v267_v10 = vmax.f32 %v224_v2, 0.0 }
 0x131   :  { %v226_v63 = vpop.f32.mrf.mxu0 }
 0x132   :  { %v227_v3 = vadd.f32 %v226_v63, %v57_v38 }
 0x134   :  { %v268_v11 = vmax.f32 %v227_v3, 0.0 }
 0x136   :  { %v348_v18 = vmul.f32 %v295_v4, %v268_v11 }
 0x139   :  { %v229_v53 = vpop.f32.mrf.mxu1 }
 0x13d   :  { %v62_v56 = vpop.permute.xlu2 %61 }
 0x13e   :  { %v230_v6 = vadd.f32 %v229_v53, %v62_v56  ;;  %v319_v56 = vpop.permute.xlu1 %318 }
 0x140   :  { %v269_v15 = vmax.f32 %v230_v6, 0.0 }
 0x141   :  { %v232_v58 = vpop.f32.mrf.mxu1 }
 0x142   :  { %v349_v21 = vmul.f32 %v299_v7, %v269_v15 }
 0x145   :  { %v67_v62 = vpop.permute.xlu2 %66 }
 0x146   :  { %v233_v12 = vadd.f32 %v232_v58, %v67_v62  ;;  %v327_v0 = vpop.permute.xlu1 %326 }
 0x148   :  { %v270_v19 = vmax.f32 %v233_v12, 0.0 }
 0x149   :  { %v235_v8 = vpop.f32.mrf.mxu1 }
 0x14a   :  { %v236_v16 = vadd.f32 %v235_v8, %v72_v42  ;;  %v350_v25 = vmul.f32 %v303_v24, %v270_v19 }
 0x14c   :  { %v271_v22 = vmax.f32 %v236_v16, 0.0 }
 0x14e   :  { %v291_v13 = vpop.permute.xlu2 %290  ;;  %v351_v28 = vmul.f32 %v307_v27, %v271_v22 }
 0x14f   :  { %v347_v17 = vmul.f32 %v291_v13, %v267_v10  ;;  %v335_v10 = vpop.permute.xlu1 %334 }
 0x151   :  { %v362_v20 = vadd.f32 %v361_v14, %v347_v17  ;;  %v238_v30 = vpop.f32.mrf.mxu1 }
 0x152   :  { %v239_v32 = vadd.f32 %v238_v30, %v77_v41 }
 0x153   :  { %v363_v23 = vadd.f32 %v362_v20, %v348_v18 }
 0x154   :  { %v272_v33 = vmax.f32 %v239_v32, 0.0 }
 0x155   :  { %v364_v26 = vadd.f32 %v363_v23, %v349_v21 }
 0x156   :  { %v352_v37 = vmul.f32 %v311_v36, %v272_v33 }
 0x157   :  { %v365_v29 = vadd.f32 %v364_v26, %v350_v25  ;;  %v343_v20 = vpop.permute.xlu1 %342 }
 0x159   :  { %v366_v31 = vadd.f32 %v365_v29, %v351_v28 }
 0x15b   :  { %v367_v40 = vadd.f32 %v366_v31, %v352_v37 }
 0x15f   :  { %v241_v34 = vpop.f32.mrf.mxu2 }
 0x160   :  { %v242_v35 = vadd.f32 %v241_v34, %v82_v45 }
 0x162   :  { %v273_v38 = vmax.f32 %v242_v35, 0.0 }
 0x164   :  { %v353_v42 = vmul.f32 %v315_v39, %v273_v38 }
 0x166   :  { %v368_v43 = vadd.f32 %v367_v40, %v353_v42 }
 0x167   :  { %v244_v48 = vpop.f32.mrf.mxu2 }
 0x168   :  { %v245_v51 = vadd.f32 %v244_v48, %v568_v44 }
 0x16a   :  { %v274_v57 = vmax.f32 %v245_v51, 0.0 }
 0x16c   :  { %v354_v41 = vmul.f32 %v319_v56, %v274_v57 }
 0x16e   :  { %v369_v62 = vadd.f32 %v368_v43, %v354_v41 }
 0x16f   :  { %v247_v53 = vpop.f32.mrf.mxu2 }
 0x170   :  { %v248_v55 = vadd.f32 %v247_v53, %v572_v47  ;;  %v331_v47 = vpop.permute.xlu0 %330 }
 0x172   :  { %v275_v58 = vmax.f32 %v248_v55, 0.0 }
 0x174   :  { %v355_v45 = vmul.f32 %v323_v59, %v275_v58 }
 0x176   :  { %v370_v1 = vadd.f32 %v369_v62, %v355_v45 }
 0x177   :  { %v250_v60 = vpop.f32.mrf.mxu2 }
 0x178   :  { %v251_v61 = vadd.f32 %v250_v60, %v570_v46  ;;  %v339_v16 = vpop.permute.xlu0 %338 }
 0x17a   :  { %v276_v63 = vmax.f32 %v251_v61, 0.0 }
 0x17c   :  { %v356_v2 = vmul.f32 %v327_v0, %v276_v63 }
 0x17e   :  { %v371_v3 = vadd.f32 %v370_v1, %v356_v2 }
 0x17f   :  { %v253_v4 = vpop.f32.mrf.mxu3 }
 0x180   :  { %v254_v44 = vadd.f32 %v253_v4, %v576_v50 }
 0x182   :  { %v277_v5 = vmax.f32 %v254_v44, 0.0 }
 0x184   :  { %v357_v7 = vmul.f32 %v331_v47, %v277_v5 }
 0x186   :  { %v372_v11 = vadd.f32 %v371_v3, %v357_v7 }
 0x187   :  { %v256_v6 = vpop.f32.mrf.mxu3 }
 0x188   :  { %v257_v8 = vadd.f32 %v256_v6, %v574_v49 }
 0x18a   :  { %v278_v9 = vmax.f32 %v257_v8, 0.0 }
 0x18c   :  { %v358_v12 = vmul.f32 %v335_v10, %v278_v9 }
 0x18e   :  { %v373_v46 = vadd.f32 %v372_v11, %v358_v12 }
 0x18f   :  { %v259_v13 = vpop.f32.mrf.mxu3 }
 0x190   :  { %v260_v14 = vadd.f32 %v259_v13, %v580_v54  ;;  %v383_v54 = vstv %s598_s3 }
 0x192   :  { %v279_v15 = vmax.f32 %v260_v14, 0.0 }
 0x194   :  { %v359_v18 = vmul.f32 %v339_v16, %v279_v15 }
 0x196   :  { %v374_v21 = vadd.f32 %v373_v46, %v359_v18 }
 0x197   :  { %v262_v17 = vpop.f32.mrf.mxu3 }
 0x198   :  { %v263_v50 = vadd.f32 %v262_v17, %v578_v52 }
 0x19a   :  { %v280_v19 = vmax.f32 %v263_v50, 0.0 }
 0x19c   :  { %v360_v22 = vmul.f32 %v343_v20, %v280_v19 }
 0x19e   :  { %v375_v23 = vadd.f32 %v374_v21, %v360_v22 }
 0x1a0   :  { %v376_v49 = vrot.slane %v375_v23, 4 }
 0x1a2   :  { %v377_v24 = vadd.f32 %v376_v49, %v375_v23 }
 0x1a4   :  { %v378_v25 = vrot.slane %v377_v24, 2 }
 0x1a6   :  { %v379_v26 = vadd.f32 %v378_v25, %v377_v24 }
 0x1a8   :  { %v380_v27 = vrot.slane %v379_v26, 1 }
 0x1aa   :  { %v381_v52 = vadd.f32 %v380_v27, %v379_v26 }
 0x1ac   :  { %v384_v28 = vadd.f32 %v383_v54, %v381_v52 }
 0x1ae   :  { %385 = vst [vmem:[#allocation3] sm:$0x1] %v384_v28 }
 0x1af   :  { %396 = dma.vmem_to_hbm [thread:$0]  %s392_s29, 16, %s394_s5, [#allocation4]  }
 0x1b0   :  { %458 = dma.done.wait [#allocation4], 16  }
 0x1b1   :  { %459 = vsyncadd [#allocation4], 4294967280 }
 0x1b2   :  { %401 = vsyncpa [#allocation4], 1 }

</bundles_post_ra>
